<compile_context>
chip_gen: v6e
topology: v6e:2x2x1
jax: 0.10.0
libtpu: 0.0.40
codegen_flags: <defaults>
</compile_context>

<pallas_src>
import jax
import jax.numpy as jnp
from jax.experimental import pallas as pl
from jax.experimental.pallas import tpu as pltpu

_LANES = 128


def _rotate_kernel(x_ref, w_ref, o_ref):
    # Cast the tile in VMEM (free on the VPU) and do one MXU matmul.
    x = x_ref[...].astype(w_ref.dtype)
    o_ref[...] = jnp.dot(
        x, w_ref[...], preferred_element_type=jnp.float32
    ).astype(o_ref.dtype)


def rotate_layer(x, weight, *, tm_max=4096):
    """RotateLayer forward: x.astype(weight.dtype) @ weight.

    x: [..., n]   weight: [n, n]   ->   [..., n] in weight.dtype.
    """
    n = weight.shape[0]
    assert weight.shape == (n, n)
    assert x.shape[-1] == n

    out_dtype = weight.dtype
    lead_shape = x.shape[:-1]
    m = 1
    for d in lead_shape:
        m *= d
    if m == 0:
        return jnp.zeros((*lead_shape, n), out_dtype)

    x2d = x.reshape(m, n)

    # ---- lane-dense packing (n < 128) --------------------------------------
    if n < _LANES and _LANES % n == 0:
        pack = _LANES // n
    else:
        pack = 1

    m_pad = (-m) % pack
    if m_pad:
        x2d = jnp.pad(x2d, ((0, m_pad), (0, 0)))
    mp = (m + m_pad) // pack
    nk = n * pack

    xp = x2d.reshape(mp, nk)  # row-major reshape: layout preserving
    if pack > 1:
        # Block-diagonal weight: packed_out = packed_x @ kron(I_pack, W).
        wp = jnp.kron(jnp.eye(pack, dtype=weight.dtype), weight)
    else:
        wp = weight

    # ---- M tiling sized for VMEM (portable to v7x's 32 MiB scoped limit) ----
    itemsize_x = xp.dtype.itemsize
    itemsize_o = jnp.dtype(out_dtype).itemsize
    itemsize_w = wp.dtype.itemsize
    vmem_budget = 24 * 1024 * 1024                     # headroom under 32 MiB
    w_vmem = 2 * nk * nk * itemsize_w                  # resident W (conservative x2)
    per_row = 2 * nk * (itemsize_x + itemsize_o)       # dbl-buffered x + out row
    tm_fit = max(8, (vmem_budget - w_vmem) // per_row)
    tm_fit = max(8, (tm_fit // 8) * 8)
    tm_max = max(8, (tm_max // 8) * 8)
    tm = min(tm_max, tm_fit)
    # NOTE: very large n (weight itself not fitting VMEM) would additionally
    # need K/N tiling of the weight; not needed for this module's sizes.
    if mp <= tm:
        tm = mp                                        # full-dim block is allowed
    grid_m = pl.cdiv(mp, tm)

    cost = pl.CostEstimate(
        flops=2 * mp * nk * nk,
        transcendentals=0,
        bytes_accessed=mp * nk * itemsize_x + nk * nk * itemsize_w
        + mp * nk * itemsize_o,
    )

    out_p = pl.pallas_call(
        _rotate_kernel,
        out_shape=jax.ShapeDtypeStruct((mp, nk), out_dtype),
        grid_spec=pltpu.PrefetchScalarGridSpec(
            num_scalar_prefetch=0,
            grid=(grid_m,),
            in_specs=[
                pl.BlockSpec((tm, nk), lambda i: (i, 0)),
                pl.BlockSpec((nk, nk), lambda i: (0, 0)),  # weight stays resident
            ],
            out_specs=pl.BlockSpec((tm, nk), lambda i: (i, 0)),
        ),
        compiler_params=pltpu.CompilerParams(
            dimension_semantics=("parallel",),  # shard M tiles across TCs (v7x)
            vmem_limit_bytes=32 * 1024 * 1024,
        ),
        cost_estimate=cost,
    )(xp, wp)

    out2d = out_p.reshape(mp * pack, n)
    if m_pad:
        out2d = out2d[:m]
    return out2d.reshape(*lead_shape, n)


def make_orthogonal_weight(key, n, dtype=jnp.float32):
    """Deterministic orthogonal init matching torch.nn.init.orthogonal_ semantics
    (QR of a random normal matrix, sign-corrected by diag(R))."""
    a = jax.random.normal(key, (n, n), dtype=jnp.float32)
    q, r = jnp.linalg.qr(a)
    d = jnp.sign(jnp.diagonal(r))
    q = q * d[None, :]
    return q.astype(dtype)


if __name__ == "__main__":
    key = jax.random.PRNGKey(0)
    k_w, k_x, k_x2 = jax.random.split(key, 3)

    n = 32          # hidden size (rotation dimension)
    batch, seq = 2, 8

    weight = make_orthogonal_weight(k_w, n, dtype=jnp.float32)   # [n, n]
    x = jax.random.normal(k_x, (batch, seq, n), dtype=jnp.float32)

    out = rotate_layer(x, weight)
    out = jax.block_until_ready(out)
    ref = jnp.matmul(x.astype(weight.dtype), weight)
    assert out.shape == (batch, seq, n)
    assert jnp.allclose(out, ref, atol=1e-4, rtol=1e-4)

    # Second check: odd row count + tiny tile to exercise row padding, the
    # multi-tile grid with a ragged tail tile, and the in-kernel dtype cast.
    x2 = jax.random.normal(k_x2, (2, 41, n), dtype=jnp.bfloat16)
    out2 = jax.block_until_ready(rotate_layer(x2, weight, tm_max=8))
    ref2 = jnp.matmul(x2.astype(weight.dtype), weight)
    assert out2.shape == (2, 41, n)
    assert out2.dtype == weight.dtype
    assert jnp.allclose(out2, ref2, atol=1e-3, rtol=1e-3)

    print("KERNEL_OK")
</pallas_src>

<mosaic_0001>
module attributes {stable_mosaic.version = 11 : i64} {
  func.func @_rotate_kernel(%arg0: i32, %arg1: memref<4x128xf32, #tpu.memory_space<vmem>>, %arg2: memref<128x128xf32, #tpu.memory_space<vmem>>, %arg3: memref<4x128xf32, #tpu.memory_space<vmem>>) attributes {dimension_semantics = [#tpu.dimension_semantics<parallel>], iteration_bounds = array<i64: 1>, scalar_prefetch = 0 : i64, scratch_operands = 0 : i64, tpu.core_type = #tpu.core_type<tc>, window_params = [{transform_indices = @transform_0, window_bounds = array<i64: 4, 128>}, {pipeline_mode = #tpu.pipeline_mode<synchronous>, transform_indices = @transform_1, window_bounds = array<i64: 128, 128>}, {transform_indices = @transform_2, window_bounds = array<i64: 4, 128>}]} {
    %c0 = arith.constant 0 : index
    %c0_0 = arith.constant 0 : index
    %0 = vector.load %arg1[%c0, %c0_0] : memref<4x128xf32, #tpu.memory_space<vmem>>, vector<4x128xf32>
    %c0_1 = arith.constant 0 : index
    %c0_2 = arith.constant 0 : index
    %1 = vector.load %arg2[%c0_1, %c0_2] : memref<128x128xf32, #tpu.memory_space<vmem>>, vector<128x128xf32>
    %cst = arith.constant dense<0.000000e+00> : vector<4x128xf32>
    %2 = tpu.matmul %0, %1, %cst {dimension_numbers = #tpu.dot_dimension_numbers<[1], [0], [0], [1], [0, 0, 1, 1], [], []>} : vector<4x128xf32>, vector<128x128xf32>, vector<4x128xf32> -> vector<4x128xf32>
    %c0_3 = arith.constant 0 : index
    %c0_4 = arith.constant 0 : index
    %3 = vector.load %arg3[%c0_3, %c0_4] : memref<4x128xf32, #tpu.memory_space<vmem>>, vector<4x128xf32>
    tpu.vector_store %arg3[%c0_3, %c0_4], %2 {strides = array<i32>} : memref<4x128xf32, #tpu.memory_space<vmem>>, vector<4x128xf32>,
    return
  }
  func.func @transform_0(%arg0: i32) -> (i32, i32) {
    %c0_i32 = arith.constant 0 : i32
    %c0_i32_0 = arith.constant 0 : i32
    return %arg0, %c0_i32 : i32, i32
  }
  func.func @transform_1(%arg0: i32) -> (i32, i32) {
    %c0_i32 = arith.constant 0 : i32
    %c0_i32_0 = arith.constant 0 : i32
    %c0_i32_1 = arith.constant 0 : i32
    return %c0_i32, %c0_i32_0 : i32, i32
  }
  func.func @transform_2(%arg0: i32) -> (i32, i32) {
    %c0_i32 = arith.constant 0 : i32
    %c0_i32_0 = arith.constant 0 : i32
    return %arg0, %c0_i32 : i32, i32
  }
}

</mosaic_0001>

<bundles_post_ra>
// kernel: tpu_custom_call.1
= control target key start
LH: loop header
LB: loop body
LE: loop exit
PB: predicated region body
PF: predicated region fallthrough
CT: control target
= control target key end

     0   :  { %7 = vsyncpa [#allocation3], 0  ;;  %s298_s0 = inlined_call_operand.hbm [shape: f32[4,128], index: 0, kind: input, shape index: {}]   ;;  %s299_s1 = inlined_call_operand.hbm [shape: f32[128,128], index: 1, kind: input, shape index: {}]   ;;  %s300_s2 = inlined_call_operand.hbm [shape: f32[4,128], index: 2, kind: output, shape index: {}]  }
   0x1   :  { %8 = vsyncpa [#allocation6], 0 }
   0x2   :  { %9 = vsyncpa [#allocation4], 0  ;;  %s267_s9 = smov [#allocation2]   ;;  %s268_s11 = smov [#allocation5]  }
   0x3   :  { %s16_s10 = sshll.u32 %s267_s9, 4  ;;  %s25_s12 = sshll.u32 %s268_s11, 4  ;;  %s17_s10 = int_to_ptr.vmem [resolvable:$true] %s16_s10  ;;  %s26_s12 = int_to_ptr.vmem [resolvable:$true] %s25_s12 }
   0x4   :  { %s209_s13 = scalar_lea.vmem %s17_s10, 64  ;;  %p214_p1 = scmp.lt.s32.totalorder %s17_s10, %s17_s10 }
   0x5   :  { %p210_p0 = scmp.ne.s32.totalorder %s17_s10, %s209_s13  ;;  %p215_p2 = scmp.lt.s32.totalorder %s209_s13, %s209_s13 }
   0x7   :  { %p216_p3 = por %p215_p2, %p214_p1 }
   0x9   :  { %p217_p4 = pnand %p216_p3, %p210_p0 }
   0xb   :  { %220 = shalt.err (!%p217_p4)
}
   0xc   :  { %19 = dma.hbm_to_vmem [thread:$0]  %s298_s0, 64, %s17_s10, [#allocation3]  }
   0xd   :  { %s229_s16 = scalar_lea.vmem %s26_s12, 2048  ;;  %p234_p6 = scmp.lt.s32.totalorder %s26_s12, %s26_s12 }
   0xe   :  { %p230_p5 = scmp.ne.s32.totalorder %s26_s12, %s229_s16  ;;  %p235_p7 = scmp.lt.s32.totalorder %s229_s16, %s229_s16 }
  0x10   :  { %p236_p8 = por %p235_p7, %p234_p6 }
  0x12   :  { %p237_p9 = pnand %p236_p8, %p230_p5 }
  0x14   :  { %240 = shalt.err (!%p237_p9)
}
  0x15   :  { %s269_s17 = smov 128   ;;  %s270_s18 = smov 8  }
  0x16   :  { %31 = dma.hbm_to_vmem [thread:$0]  %s299_s1, 2048, %s26_s12, [#allocation6], %s269_s17, %s269_s17, %s270_s18  }
  0x17   :  { %261 = dma.done.wait [#allocation3], 64  }
  0x18   :  { %262 = vsyncadd [#allocation3], 4294967232 }
  0x19   :  { %263 = dma.done.wait [#allocation6], 2048  }
  0x1a   :  { %264 = vsyncadd [#allocation6], 4294965248  ;;  %v271_v0 = vmov 0.0   ;;  %vm272_vm0 = vmmov 0   ;;  %v54_v1 = vld [vmem:[#allocation5 + $0x78] sm:$0xff]  ;;  %v53_v2 = vld [vmem:[#allocation5 + $0x70] sm:$0xff] }
  0x1b   :  { %159 = vmatprep.subr.mxu0 %v271_v0  ;;  %191 = vmatprep.mubr.msk.f32.mxu0 %vm272_vm0, %v271_v0  ;;  %v52_v3 = vld [vmem:[#allocation5 + $0x68] sm:$0xff]  ;;  %v51_v4 = vld [vmem:[#allocation5 + $0x60] sm:$0xff]  ;;  %v50_v5 = vld [vmem:[#allocation5 + $0x58] sm:$0xff]  ;;  %s273_s0 = smov [#allocation7]  }
  0x1c   :  { %160 = vmatpush3.msra.mxu0 %v54_v1  ;;  %v49_v6 = vld [vmem:[#allocation5 + $0x50] sm:$0xff]  ;;  %v48_v7 = vld [vmem:[#allocation5 + $0x48] sm:$0xff]  ;;  %v47_v8 = vld [vmem:[#allocation5 + $0x40] sm:$0xff]  ;;  %s132_s1 = sshll.u32 %s273_s0, 4  ;;  %s133_s1 = int_to_ptr.vmem [resolvable:$true] %s132_s1 }
  0x1d   :  { %161 = vmatprep.subr.mxu0 %v271_v0  ;;  %v46_v9 = vld [vmem:[#allocation5 + $0x38] sm:$0xff]  ;;  %v45_v10 = vld [vmem:[#allocation5 + $0x30] sm:$0xff]  ;;  %v44_v11 = vld [vmem:[#allocation5 + $0x28] sm:$0xff]  ;;  %s241_s21 = scalar_lea.vmem %s133_s1, 64  ;;  %p246_p11 = scmp.lt.s32.totalorder %s133_s1, %s133_s1 }
  0x1e   :  { %162 = vmatpush3.msra.mxu0 %v53_v2  ;;  %v43_v12 = vld [vmem:[#allocation5 + $0x20] sm:$0xff]  ;;  %v42_v13 = vld [vmem:[#allocation5 + $0x18] sm:$0xff]  ;;  %v41_v14 = vld [vmem:[#allocation5 + $0x10] sm:$0xff]  ;;  %p242_p10 = scmp.ne.s32.totalorder %s133_s1, %s241_s21  ;;  %p247_p12 = scmp.lt.s32.totalorder %s241_s21, %s241_s21 }
  0x1f   :  { %163 = vmatprep.subr.mxu0 %v271_v0  ;;  %v40_v15 = vld [vmem:[#allocation5 + $0x8] sm:$0xff]  ;;  %v39_v16 = vld [vmem:[#allocation5] sm:$0xff]  ;;  %v38_v17 = vld [vmem:[#allocation2] sm:$0xf] }
  0x20   :  { %164 = vmatpush3.msra.mxu0 %v52_v3  ;;  %p248_p13 = por %p247_p12, %p246_p11 }
  0x21   :  { %165 = vmatprep.subr.mxu0 %v271_v0 }
  0x22   :  { %166 = vmatpush3.msra.mxu0 %v51_v4  ;;  %p249_p0 = pnand %p248_p13, %p242_p10 }
  0x23   :  { %167 = vmatprep.subr.mxu0 %v271_v0 }
  0x24   :  { %168 = vmatpush3.msra.mxu0 %v50_v5 }
  0x25   :  { %169 = vmatprep.subr.mxu0 %v271_v0 }
  0x26   :  { %170 = vmatpush3.msra.mxu0 %v49_v6 }
  0x27   :  { %171 = vmatprep.subr.mxu0 %v271_v0 }
  0x28   :  { %172 = vmatpush3.msra.mxu0 %v48_v7 }
  0x29   :  { %173 = vmatprep.subr.mxu0 %v271_v0 }
  0x2a   :  { %174 = vmatpush3.msra.mxu0 %v47_v8 }
  0x2b   :  { %175 = vmatprep.subr.mxu0 %v271_v0 }
  0x2c   :  { %176 = vmatpush3.msra.mxu0 %v46_v9 }
  0x2d   :  { %177 = vmatprep.subr.mxu0 %v271_v0 }
  0x2e   :  { %178 = vmatpush3.msra.mxu0 %v45_v10 }
  0x2f   :  { %179 = vmatprep.subr.mxu0 %v271_v0 }
  0x30   :  { %180 = vmatpush3.msra.mxu0 %v44_v11 }
  0x31   :  { %181 = vmatprep.subr.mxu0 %v271_v0 }
  0x32   :  { %182 = vmatpush3.msra.mxu0 %v43_v12 }
  0x33   :  { %183 = vmatprep.subr.mxu0 %v271_v0 }
  0x34   :  { %184 = vmatpush3.msra.mxu0 %v42_v13 }
  0x35   :  { %185 = vmatprep.subr.mxu0 %v271_v0 }
  0x36   :  { %186 = vmatpush3.msra.mxu0 %v41_v14 }
  0x37   :  { %187 = vmatprep.subr.mxu0 %v271_v0 }
  0x38   :  { %188 = vmatpush3.msra.mxu0 %v40_v15 }
  0x39   :  { %189 = vmatprep.subr.mxu0 %v271_v0 }
  0x3a   :  { %190 = vmatpush3.msra.mxu0 %v39_v16 }
  0x3b   :  { %192 = vmatmul.mubr.f32.vlgmr.msra.gmra.mxu0 %v38_v17 }
  0xfb   :  { %v121_v18 = vpop.f32.mrf.mxu0 }
  0xfc   :  { %125 = vst [vmem:[#allocation7] sm:$0xf] %v121_v18 }
  0xfd   :  { %v193_v19 = vpop.f32.mrf.mxu0 }
  0xfe   :  { %252 = shalt.err (!%p249_p0)
}
  0xff   :  { %135 = dma.vmem_to_hbm [thread:$0]  %s133_s1, 64, %s300_s2, [#allocation4]  }
 0x100   :  { %265 = dma.done.wait [#allocation4], 64  }
 0x101   :  { %266 = vsyncadd [#allocation4], 4294967232 }
 0x102   :  { %139 = vsyncpa [#allocation3], 1 }
 0x103   :  { %140 = vsyncpa [#allocation6], 1 }
 0x104   :  { %141 = vsyncpa [#allocation4], 1 }

</bundles_post_ra>
